<compile_context>
chip_gen: v7x
topology: tpu7x:2x2x1
jax: 0.10.0
libtpu: 0.0.40
codegen_flags: <defaults>
</compile_context>

<pallas_src>
import jax
import jax.numpy as jnp
from jax.experimental import pallas as pl
from jax.experimental.pallas import tpu as pltpu


# ----------------------------------------------------------------------------
# Exact (erf-based) GELU, matching PyTorch nn.GELU() default.
# erf is evaluated with the Abramowitz & Stegun 7.1.26 polynomial
# (max abs error ~1.5e-7) using only exp / mul / add / where, which are all
# guaranteed to lower in Mosaic (no reliance on a lax.erf lowering rule).
# ----------------------------------------------------------------------------
def _erf(x):
    a1, a2, a3, a4, a5 = (0.254829592, -0.284496736, 1.421413741,
                          -1.453152027, 1.061405429)
    p = 0.3275911
    sgn = jnp.where(x >= 0.0, 1.0, -1.0)
    ax = jnp.abs(x)
    t = 1.0 / (1.0 + p * ax)
    poly = ((((a5 * t + a4) * t + a3) * t + a2) * t + a1) * t
    y = 1.0 - poly * jnp.exp(-(ax * ax))
    return sgn * y


def _gelu_exact(x):
    return 0.5 * x * (1.0 + _erf(x * 0.7071067811865476))


# ----------------------------------------------------------------------------
# Fused FFN kernel: one grid step = one tile of TM (batch*position) rows.
#   x_ref: (TM, Cin)   w1_ref: (H, Cin)   b1_ref: (1, H)
#   w2_ref: (Cin, H)   b2_ref: (1, Cin)   o_ref: (TM, Cin)
# ----------------------------------------------------------------------------
def _ffn_kernel(x_ref, w1_ref, b1_ref, w2_ref, b2_ref, o_ref):
    x = x_ref[...]
    # fc1: contract Cin on the MXU with f32 accumulation.
    h = jax.lax.dot_general(
        x, w1_ref[...], (((1,), (1,)), ((), ())),
        preferred_element_type=jnp.float32,
    ) + b1_ref[...].astype(jnp.float32)
    h = _gelu_exact(h)                                   # (TM, H) in f32
    # fc2: contract H; cast activations back to the weight dtype for the MXU.
    y = jax.lax.dot_general(
        h.astype(w2_ref.dtype), w2_ref[...], (((1,), (1,)), ((), ())),
        preferred_element_type=jnp.float32,
    ) + b2_ref[...].astype(jnp.float32)
    o_ref[...] = y.astype(o_ref.dtype)


def _pick_row_tile(M):
    """Biggest row tile (<=512, multiple of 8, dividing M), preferring >=2 grid steps."""
    best = None
    for tm in (512, 256, 128, 64, 32, 16, 8):
        if tm <= M and M % tm == 0:
            if M // tm >= 2:
                return tm
            if best is None:
                best = tm
    return best if best is not None else M


def ffn_fused(x2d, w1, b1, w2, b2):
    """x2d: (M, Cin), w1: (H, Cin), b1: (1, H), w2: (Cin, H), b2: (1, Cin)."""
    M, Cin = x2d.shape
    H = w1.shape[0]
    TM = _pick_row_tile(M)
    grid = (pl.cdiv(M, TM),)
    return pl.pallas_call(
        _ffn_kernel,
        out_shape=jax.ShapeDtypeStruct((M, Cin), x2d.dtype),
        grid=grid,
        in_specs=[
            pl.BlockSpec((TM, Cin), lambda i: (i, 0)),   # activations, tiled over M
            pl.BlockSpec((H, Cin), lambda i: (0, 0)),    # W1 (resident)
            pl.BlockSpec((1, H), lambda i: (0, 0)),      # b1
            pl.BlockSpec((Cin, H), lambda i: (0, 0)),    # W2 (resident)
            pl.BlockSpec((1, Cin), lambda i: (0, 0)),    # b2
        ],
        out_specs=pl.BlockSpec((TM, Cin), lambda i: (i, 0)),
        compiler_params=pltpu.CompilerParams(dimension_semantics=("parallel",)),
    )(x2d, w1, b1, w2, b2)


# ----------------------------------------------------------------------------
# Module forward (layout plumbing in plain JAX, all compute in one kernel)
# ----------------------------------------------------------------------------
def feedforward_forward(x, params, *, groups=1):
    """x: (B, dim*groups, N) in PyTorch NCW layout -> (B, dim*groups, N)."""
    # TODO(synk): groups > 1 (grouped 1x1 conv == block-diagonal weights) not
    # implemented; module default groups=1 only.
    assert groups == 1
    B, Cin, N = x.shape
    H = params["w1"].shape[0]
    xt = jnp.transpose(x, (0, 2, 1)).reshape(B * N, Cin)        # (M, Cin), channels-last
    y = ffn_fused(
        xt,
        params["w1"],
        params["b1"].reshape(1, H),
        params["w2"],
        params["b2"].reshape(1, Cin),
    )
    return jnp.transpose(y.reshape(B, N, Cin), (0, 2, 1))       # back to NCW


# ----------------------------------------------------------------------------
# Pure-JAX reference (mirrors the PyTorch forward exactly) for verification
# ----------------------------------------------------------------------------
def reference_forward(x, params):
    h = jnp.einsum("hc,bcn->bhn", params["w1"], x) + params["b1"][None, :, None]
    h = jax.nn.gelu(h, approximate=False)                       # exact erf GELU
    y = jnp.einsum("ch,bhn->bcn", params["w2"], h) + params["b2"][None, :, None]
    return y


# ----------------------------------------------------------------------------
if __name__ == "__main__":
    # Small shapes consistent with the module: FeedForward(dim=32, mult=4, groups=1)
    B, dim, N = 2, 32, 16
    mult, groups = 4, 1
    input_dim = dim * groups           # 32
    hidden_dim = dim * mult * groups   # 128

    key = jax.random.PRNGKey(0)
    kx, k1, kb1, k2, kb2 = jax.random.split(key, 5)

    x = jax.random.normal(kx, (B, input_dim, N), dtype=jnp.float32)

    params = {
        # nn.Conv1d(input_dim, hidden_dim, 1).weight -> (hidden, input, 1), squeezed
        "w1": 0.1 * jax.random.normal(k1, (hidden_dim, input_dim), jnp.float32),
        "b1": 0.05 * jax.random.normal(kb1, (hidden_dim,), jnp.float32),
        # nn.Conv1d(hidden_dim, input_dim, 1).weight -> (input, hidden, 1), squeezed
        "w2": 0.1 * jax.random.normal(k2, (input_dim, hidden_dim), jnp.float32),
        "b2": 0.05 * jax.random.normal(kb2, (input_dim,), jnp.float32),
    }

    out = feedforward_forward(x, params, groups=groups)
    out = jax.block_until_ready(out)

    ref = reference_forward(x, params)
    assert out.shape == (B, input_dim, N)
    assert jnp.allclose(out, ref, rtol=1e-3, atol=1e-3), float(
        jnp.max(jnp.abs(out - ref))
    )

    print("KERNEL_OK")
</pallas_src>

<mosaic_0001>
module attributes {stable_mosaic.version = 11 : i64} {
  func.func @_ffn_kernel(%arg0: i32, %arg1: memref<16x32xf32, #tpu.memory_space<vmem>>, %arg2: memref<128x32xf32, #tpu.memory_space<vmem>>, %arg3: memref<1x128xf32, #tpu.memory_space<vmem>>, %arg4: memref<32x128xf32, #tpu.memory_space<vmem>>, %arg5: memref<1x32xf32, #tpu.memory_space<vmem>>, %arg6: memref<16x32xf32, #tpu.memory_space<vmem>>) attributes {dimension_semantics = [#tpu.dimension_semantics<parallel>], iteration_bounds = array<i64: 2>, scalar_prefetch = 0 : i64, scratch_operands = 0 : i64, tpu.core_type = #tpu.core_type<tc>, window_params = [{transform_indices = @transform_0, window_bounds = array<i64: 16, 32>}, {pipeline_mode = #tpu.pipeline_mode<synchronous>, transform_indices = @transform_1, window_bounds = array<i64: 128, 32>}, {pipeline_mode = #tpu.pipeline_mode<synchronous>, transform_indices = @transform_2, window_bounds = array<i64: 1, 128>}, {pipeline_mode = #tpu.pipeline_mode<synchronous>, transform_indices = @transform_3, window_bounds = array<i64: 32, 128>}, {pipeline_mode = #tpu.pipeline_mode<synchronous>, transform_indices = @transform_4, window_bounds = array<i64: 1, 32>}, {transform_indices = @transform_5, window_bounds = array<i64: 16, 32>}]} {
    %c0 = arith.constant 0 : index
    %c0_0 = arith.constant 0 : index
    %0 = vector.load %arg1[%c0, %c0_0] : memref<16x32xf32, #tpu.memory_space<vmem>>, vector<16x32xf32>
    %c0_1 = arith.constant 0 : index
    %c0_2 = arith.constant 0 : index
    %1 = vector.load %arg2[%c0_1, %c0_2] : memref<128x32xf32, #tpu.memory_space<vmem>>, vector<128x32xf32>
    %cst = arith.constant dense<0.000000e+00> : vector<16x128xf32>
    %2 = tpu.matmul %0, %1, %cst {dimension_numbers = #tpu.dot_dimension_numbers<[1], [1], [0], [0], [0, 0, 1, 0], [], []>} : vector<16x32xf32>, vector<128x32xf32>, vector<16x128xf32> -> vector<16x128xf32>
    %c0_3 = arith.constant 0 : index
    %c0_4 = arith.constant 0 : index
    %3 = vector.load %arg3[%c0_3, %c0_4] : memref<1x128xf32, #tpu.memory_space<vmem>>, vector<1x128xf32>
    %4 = vector.broadcast %3 : vector<1x128xf32> to vector<16x128xf32>
    %5 = arith.addf %2, %4 : vector<16x128xf32>
    %cst_5 = arith.constant 5.000000e-01 : f32
    %6 = vector.broadcast %cst_5 : f32 to vector<16x128xf32>
    %7 = arith.mulf %6, %5 : vector<16x128xf32>
    %cst_6 = arith.constant 0.707106769 : f32
    %8 = vector.broadcast %cst_6 : f32 to vector<16x128xf32>
    %9 = arith.mulf %5, %8 : vector<16x128xf32>
    %cst_7 = arith.constant 0.000000e+00 : f32
    %10 = vector.broadcast %cst_7 : f32 to vector<16x128xf32>
    %11 = arith.cmpf oge, %9, %10 : vector<16x128xf32>
    %cst_8 = arith.constant 1.000000e+00 : f32
    %cst_9 = arith.constant -1.000000e+00 : f32
    %12 = vector.broadcast %cst_8 : f32 to vector<16x128xf32>
    %13 = vector.broadcast %cst_9 : f32 to vector<16x128xf32>
    %14 = arith.select %11, %12, %13 : vector<16x128xi1>, vector<16x128xf32>
    %15 = math.absf %9 : vector<16x128xf32>
    %cst_10 = arith.constant 0.327591091 : f32
    %16 = vector.broadcast %cst_10 : f32 to vector<16x128xf32>
    %17 = arith.mulf %16, %15 : vector<16x128xf32>
    %cst_11 = arith.constant 1.000000e+00 : f32
    %18 = vector.broadcast %cst_11 : f32 to vector<16x128xf32>
    %19 = arith.addf %18, %17 : vector<16x128xf32>
    %cst_12 = arith.constant 1.000000e+00 : f32
    %20 = vector.broadcast %cst_12 : f32 to vector<16x128xf32>
    %21 = arith.divf %20, %19 : vector<16x128xf32>
    %cst_13 = arith.constant 1.06140542 : f32
    %22 = vector.broadcast %cst_13 : f32 to vector<16x128xf32>
    %23 = arith.mulf %22, %21 : vector<16x128xf32>
    %cst_14 = arith.constant -1.45315206 : f32
    %24 = vector.broadcast %cst_14 : f32 to vector<16x128xf32>
    %25 = arith.addf %23, %24 : vector<16x128xf32>
    %26 = arith.mulf %25, %21 : vector<16x128xf32>
    %cst_15 = arith.constant 1.42141378 : f32
    %27 = vector.broadcast %cst_15 : f32 to vector<16x128xf32>
    %28 = arith.addf %26, %27 : vector<16x128xf32>
    %29 = arith.mulf %28, %21 : vector<16x128xf32>
    %cst_16 = arith.constant -0.284496725 : f32
    %30 = vector.broadcast %cst_16 : f32 to vector<16x128xf32>
    %31 = arith.addf %29, %30 : vector<16x128xf32>
    %32 = arith.mulf %31, %21 : vector<16x128xf32>
    %cst_17 = arith.constant 0.254829586 : f32
    %33 = vector.broadcast %cst_17 : f32 to vector<16x128xf32>
    %34 = arith.addf %32, %33 : vector<16x128xf32>
    %35 = arith.mulf %34, %21 : vector<16x128xf32>
    %36 = arith.mulf %15, %15 : vector<16x128xf32>
    %cst_18 = arith.constant 0.000000e+00 : f32
    %37 = vector.broadcast %cst_18 : f32 to vector<16x128xf32>
    %38 = arith.subf %37, %36 : vector<16x128xf32>
    %39 = math.exp %38 : vector<16x128xf32>
    %40 = arith.mulf %35, %39 : vector<16x128xf32>
    %cst_19 = arith.constant 1.000000e+00 : f32
    %41 = vector.broadcast %cst_19 : f32 to vector<16x128xf32>
    %42 = arith.subf %41, %40 : vector<16x128xf32>
    %43 = arith.mulf %14, %42 : vector<16x128xf32>
    %cst_20 = arith.constant 1.000000e+00 : f32
    %44 = vector.broadcast %cst_20 : f32 to vector<16x128xf32>
    %45 = arith.addf %44, %43 : vector<16x128xf32>
    %46 = arith.mulf %7, %45 : vector<16x128xf32>
    %c0_21 = arith.constant 0 : index
    %c0_22 = arith.constant 0 : index
    %47 = vector.load %arg4[%c0_21, %c0_22] : memref<32x128xf32, #tpu.memory_space<vmem>>, vector<32x128xf32>
    %cst_23 = arith.constant dense<0.000000e+00> : vector<16x32xf32>
    %48 = tpu.matmul %46, %47, %cst_23 {dimension_numbers = #tpu.dot_dimension_numbers<[1], [1], [0], [0], [0, 0, 1, 0], [], []>} : vector<16x128xf32>, vector<32x128xf32>, vector<16x32xf32> -> vector<16x32xf32>
    %c0_24 = arith.constant 0 : index
    %c0_25 = arith.constant 0 : index
    %49 = vector.load %arg5[%c0_24, %c0_25] : memref<1x32xf32, #tpu.memory_space<vmem>>, vector<1x32xf32>
    %50 = vector.broadcast %49 : vector<1x32xf32> to vector<16x32xf32>
    %51 = arith.addf %48, %50 : vector<16x32xf32>
    %c0_26 = arith.constant 0 : index
    %c0_27 = arith.constant 0 : index
    %52 = vector.load %arg6[%c0_26, %c0_27] : memref<16x32xf32, #tpu.memory_space<vmem>>, vector<16x32xf32>
    tpu.vector_store %arg6[%c0_26, %c0_27], %51 {strides = array<i32>} : memref<16x32xf32, #tpu.memory_space<vmem>>, vector<16x32xf32>,
    return
  }
  func.func @transform_0(%arg0: i32) -> (i32, i32) {
    %c0_i32 = arith.constant 0 : i32
    %c0_i32_0 = arith.constant 0 : i32
    return %arg0, %c0_i32 : i32, i32
  }
  func.func @transform_1(%arg0: i32) -> (i32, i32) {
    %c0_i32 = arith.constant 0 : i32
    %c0_i32_0 = arith.constant 0 : i32
    %c0_i32_1 = arith.constant 0 : i32
    return %c0_i32, %c0_i32_0 : i32, i32
  }
  func.func @transform_2(%arg0: i32) -> (i32, i32) {
    %c0_i32 = arith.constant 0 : i32
    %c0_i32_0 = arith.constant 0 : i32
    %c0_i32_1 = arith.constant 0 : i32
    return %c0_i32, %c0_i32_0 : i32, i32
  }
  func.func @transform_3(%arg0: i32) -> (i32, i32) {
    %c0_i32 = arith.constant 0 : i32
    %c0_i32_0 = arith.constant 0 : i32
    %c0_i32_1 = arith.constant 0 : i32
    return %c0_i32, %c0_i32_0 : i32, i32
  }
  func.func @transform_4(%arg0: i32) -> (i32, i32) {
    %c0_i32 = arith.constant 0 : i32
    %c0_i32_0 = arith.constant 0 : i32
    %c0_i32_1 = arith.constant 0 : i32
    return %c0_i32, %c0_i32_0 : i32, i32
  }
  func.func @transform_5(%arg0: i32) -> (i32, i32) {
    %c0_i32 = arith.constant 0 : i32
    %c0_i32_0 = arith.constant 0 : i32
    return %arg0, %c0_i32 : i32, i32
  }
}

</mosaic_0001>

<bundles_post_ra>
// kernel: tpu_custom_call.1
= control target key start
LH: loop header
LB: loop body
LE: loop exit
PB: predicated region body
PF: predicated region fallthrough
CT: control target
= control target key end

     0   :  { %10 = vsyncpa [#allocation3], 0  ;;  %s1120_s0 = inlined_call_operand.vmem [shape: f32[32,32], index: 0, kind: input, shape index: {}]   ;;  %s1121_s1 = inlined_call_operand.vmem [shape: f32[128,32], index: 1, kind: input, shape index: {}]   ;;  %s1122_s2 = inlined_call_operand.vmem [shape: f32[1,128], index: 2, kind: input, shape index: {}]   ;;  %s1123_s3 = inlined_call_operand.vmem [shape: f32[32,128], index: 3, kind: input, shape index: {}]   ;;  %s1124_s4 = inlined_call_operand.vmem [shape: f32[1,32], index: 4, kind: input, shape index: {}]   ;;  %s1125_s5 = inlined_call_operand.hbm [shape: f32[32,32], index: 5, kind: output, shape index: {}]  }
   0x1   :  { %12 = vsyncpa [#allocation3 + $0x1], 0  ;;  %s906_s18 = smov 0   ;;  %s908_s19 = smov 0  }
   0x2   :  { %s910_s20 = smov 0   ;;  %s912_s21 = smov 0  }
   0x3 LB: > { %s927_s22 = sadd.s32 4294967295, %s870_s21   ;;  %s599_s23 = sadd.s32 4294967294, %s870_s21   ;;  %s870_s21 = sphi %s912_s21, %s1133_s21   ;;  %s866_s20 = sphi %s910_s20, %s1132_s20   ;;  %s862_s19 = sphi %s908_s19, %s1131_s19   ;;  %s858_s18 = sphi %s906_s18, %s1130_s18  }
   0x4   : > { %s931_s24 = sadd.s32 1, %s870_s21   ;;  %s135_s25 = sadd.s32 1, %s866_s20 }
   0x5   : > { %s132_s26 = ssub.s32 %s870_s21, %s931_s24  ;;  %p145_p0 = scmp.ne.s32.totalorder %s866_s20, %s862_s19 }
   0x6   : > { %p133_p1 = scmp.eq.s32.totalorder %s132_s26, 0  ;;  %p146_p2 = scmp.eq.s32.totalorder %s927_s22, 1 }
   0x7   : > { %p151_p3 = scmp.ne.s32.totalorder %s862_s19, %s858_s18  ;;  %p152_p4 = scmp.eq.s32.totalorder %s599_s23, 1 }
   0x8   : > { %s942_s27 = scalar_select %p133_p1, %s866_s20, %s135_s25  }
   0x9   : > { %p944_p5 = por %p146_p2, %p145_p0  ;;  %p948_p6 = por %p152_p4, %p151_p3 }
   0xa   : > { %p602_p7 = scmp.ge.s32.totalorder %s870_s21, 1  ;;  %p191_p8 = scmp.lt.s32.totalorder %s870_s21, 3 }
   0xc   : > { %p192_p9 = pnand %p602_p7, %p191_p8 }
   0xd   : > { %v228_v0 = vld [vmem:[%s1121_s1] sm:$0xff] (!%p192_p9)  ;;  %v229_v1 = vld [vmem:[%s1121_s1 + $0x8] sm:$0xff] (!%p192_p9)  ;;  %vm251_vm0 = vcmask (!%p192_p9), 261120   ;;  %v230_v2 = vld [vmem:[%s1121_s1 + $0x10] sm:$0xff] (!%p192_p9)  ;;  %s604_s11 = sshll.u32 (!%p192_p9), %s927_s22, 1  ;;  %s216_s26 = sand.u32 (!%p192_p9), 1, %s862_s19  }
   0xe   : > { %195 = sbr.rel (%p192_p9) target bundleno = 573 (0x23d), region = 40  ;;  %v702_v3 = vpack.c.bf16 (!%p192_p9), %v229_v1, %v228_v0  ;;  %vm966_vm1 = vmpackc.low (!%p192_p9), %vm251_vm0, %vm251_vm0  ;;  %v231_v5 = vld [vmem:[%s1121_s1 + $0x18] sm:$0xff] (!%p192_p9)  ;;  %p220_p10 = scmp.lt.s32.totalorder (!%p192_p9), %s604_s11, 3  ;;  %v232_v7 = vld [vmem:[%s1121_s1 + $0x20] sm:$0xff] (!%p192_p9) }
   0xf   : > { %v708_v6 = vpack.c.bf16 (!%p192_p9), %v231_v5, %v230_v2  ;;  %v233_v8 = vld [vmem:[%s1121_s1 + $0x28] sm:$0xff] (!%p192_p9)  ;;  %v234_v11 = vld [vmem:[%s1121_s1 + $0x30] sm:$0xff] (!%p192_p9)  ;;  %v235_v12 = vld [vmem:[%s1121_s1 + $0x38] sm:$0xff] (!%p192_p9)  ;;  %s603_s6 = sshll.u32 (!%p192_p9), %s216_s26, 4  ;;  %s1079_s15 = scalar_lea.sflag (!%p192_p9), [#allocation3], %s216_s26 }
  0x10   : > { %704 = vmatprep.subr.msk.bf16.mxu0 (!%p192_p9), %vm966_vm1, %v702_v3  ;;  %v714_v10 = vpack.c.bf16 (!%p192_p9), %v233_v8, %v232_v7  ;;  %v720_v13 = vpack.c.bf16 (!%p192_p9), %v235_v12, %v234_v11  ;;  %v236_v14 = vld [vmem:[%s1121_s1 + $0x40] sm:$0xff] (!%p192_p9)  ;;  %v237_v15 = vld [vmem:[%s1121_s1 + $0x48] sm:$0xff] (!%p192_p9)  ;;  %v238_v17 = vld [vmem:[%s1121_s1 + $0x50] sm:$0xff] (!%p192_p9)  ;;  %s218_s9 = scalar_lea.vmem (!%p192_p9), [#allocation2], %s603_s6  ;;  %s873_s16 = smov (!%p192_p9), [#allocation2]  }
  0x11   : > { %707 = vmatpush3.bf16.xpose.msk.msra.mxu0 (!%p192_p9), %vm966_vm1, %v702_v3  ;;  %v726_v16 = vpack.c.bf16 (!%p192_p9), %v237_v15, %v236_v14  ;;  %v239_v18 = vld [vmem:[%s1121_s1 + $0x58] sm:$0xff] (!%p192_p9)  ;;  %v240_v20 = vld [vmem:[%s1121_s1 + $0x60] sm:$0xff] (!%p192_p9)  ;;  %v241_v21 = vld [vmem:[%s1121_s1 + $0x68] sm:$0xff] (!%p192_p9)  ;;  %s537_s10 = sshll.u32 (!%p192_p9), %s218_s9, 4  ;;  %s812_s17 = sshll.u32 (!%p192_p9), %s873_s16, 4  ;;  %s1070_s10 = int_to_ptr.vmem [resolvable:$true] %s537_s10  ;;  %s813_s17 = int_to_ptr.vmem [resolvable:$false] %s812_s17 }
  0x12   : > { %710 = vmatprep.subr.msk.bf16.mxu0 (!%p192_p9), %vm966_vm1, %v708_v6  ;;  %v732_v19 = vpack.c.bf16 (!%p192_p9), %v239_v18, %v238_v17  ;;  %v738_v22 = vpack.c.bf16 (!%p192_p9), %v241_v21, %v240_v20  ;;  %v242_v23 = vld [vmem:[%s1121_s1 + $0x70] sm:$0xff] (!%p192_p9)  ;;  %v243_v24 = vld [vmem:[%s1121_s1 + $0x78] sm:$0xff] (!%p192_p9)  ;;  %v435_v27 = vld [vmem:[%s1123_s3] sm:$0xff] (!%p192_p9)  ;;  %s814_s23 = scalar_lea.vmem (!%p192_p9), %s813_s17, 512  ;;  %p815_p0 = scmp.lt.s32.totalorder (!%p192_p9), %s1070_s10, %s813_s17 }
  0x13   : > { %v744_v25 = vpack.c.bf16 (!%p192_p9), %v243_v24, %v242_v23  ;;  %v436_v28 = vld [vmem:[%s1123_s3 + $0x8] sm:$0xff] (!%p192_p9)  ;;  %v437_v29 = vld [vmem:[%s1123_s3 + $0x10] sm:$0xff] (!%p192_p9)  ;;  %v438_v31 = vld [vmem:[%s1123_s3 + $0x18] sm:$0xff] (!%p192_p9) }
  0x14   : > { %v750_v30 = vpack.c.bf16 (!%p192_p9), %v436_v28, %v435_v27  ;;  %v754_v32 = vpack.c.bf16 (!%p192_p9), %v438_v31, %v437_v29  ;;  %v606_v33 = vld [vmem:[%s1122_s2] ss:$0 sm:$0xff] (!%p192_p9) }
  0x15   : > { %s1135_s11 = smov (!%p220_p10, %s604_s11), 3 }
  0x16   : > { %s605_s14 = sshll.u32 %s1135_s11, 3  ;;  %751 = vmatprep.subr.bf16.mxu1 %v750_v30  ;;  %s631_s11 = sshll.u32 %s927_s22, 8 }
  0x17   : > { %s988_s30 = scalar_lea.vmem %s1120_s0, %s605_s14  ;;  %753 = vmatpush3.bf16.xpose.msra.mxu1 %v750_v30  ;;  %s1075_s14 = scalar_lea.hbm %s1125_s5, %s631_s11 }
  0x18   : > { %v226_v9 = vld [vmem:[%s988_s30] sm:$0xff]  ;;  %v227_v26 = vld [vmem:[%s988_s30 + $0x8] sm:$0xff]  ;;  %755 = vmatprep.subr.bf16.mxu1 %v754_v32  ;;  %s808_s22 = scalar_lea.vmem %s1070_s10, 256 }
  0x19   : > { %688 = vmatprep.mubr.msk.f32.mxu0 %vm251_vm0, %v226_v9  ;;  %713 = vmatpush3.bf16.xpose.msk.msra.mxu0 %vm966_vm1, %v708_v6  ;;  %p809_p11 = scmp.ne.s32.totalorder %s1070_s10, %s808_s22  ;;  %p816_p1 = scmp.lt.s32.totalorder %s814_s23, %s808_s22 }
  0x1a   : > { %716 = vmatprep.subr.msk.bf16.mxu0 %vm966_vm1, %v714_v10 }
  0x1b   : > { %p810_p12 = pnand %p809_p11, %p944_p5  ;;  %p817_p2 = por %p816_p1, %p815_p0 }
  0x1d   : > { %p811_p13 = pneg %p810_p12 }
  0x1f   : > { %757 = vmatpush3.bf16.xpose.msra.mxu1 %v754_v32  ;;  %p818_p3 = pnand %p817_p2, %p811_p13 }
  0x21   : > { %719 = vmatpush3.bf16.xpose.msk.msra.mxu0 %vm966_vm1, %v714_v10 }
  0x22   : > { %722 = vmatprep.subr.msk.bf16.mxu0 %vm966_vm1, %v720_v13 }
  0x29   : > { %725 = vmatpush3.bf16.xpose.msk.msra.mxu0 %vm966_vm1, %v720_v13  ;;  %v872_v13 = vmov -1.0  }
  0x2a   : > { %728 = vmatprep.subr.msk.bf16.mxu0 %vm966_vm1, %v726_v16 }
  0x31   : > { %731 = vmatpush3.bf16.xpose.msk.msra.mxu0 %vm966_vm1, %v726_v16 }
  0x32   : > { %734 = vmatprep.subr.msk.bf16.mxu0 %vm966_vm1, %v732_v19 }
  0x39   : > { %737 = vmatpush3.bf16.xpose.msk.msra.mxu0 %vm966_vm1, %v732_v19 }
  0x3a   : > { %740 = vmatprep.subr.msk.bf16.mxu0 %vm966_vm1, %v738_v22 }
  0x41   : > { %743 = vmatpush3.bf16.xpose.msk.msra.mxu0 %vm966_vm1, %v738_v22 }
  0x42   : > { %746 = vmatprep.subr.msk.bf16.mxu0 %vm966_vm1, %v744_v25 }
  0x49   : > { %749 = vmatpush3.bf16.xpose.msk.msra.mxu0 %vm966_vm1, %v744_v25  ;;  %v625_v25 = vld [vmem:[%s1124_s4] ss:$0 sm:$0xff] }
  0x50   : > { %689 = vmatmul.mubr.msk.f32.vlgmr.msra.gmra.mrb[0].mxu0 %vm251_vm0, %v227_v26 }
 0x123   : > { %v690_v34 = vpop.f32.mrb[0].mxu0 }
 0x124   : > { %v378_v35 = vadd.f32 %v690_v34, %v606_v33  ;;  %v372_v36 = vpop.f32.mrb[1].mxu0 }
 0x125   : > { %v373_v37 = vadd.f32 %v606_v33, %v372_v36 }
 0x126   : > { %v384_v38 = vmul.f32 0.70710677, %v378_v35  ;;  %v382_v22 = vmul.f32 0.5, %v378_v35 }
 0x127   : > { %v383_v39 = vmul.f32 0.70710677, %v373_v37  ;;  %v381_v20 = vmul.f32 0.5, %v373_v37 }
 0x128   : > { %v390_v40 = vand.u32 2147483647, %v384_v38  ;;  %vm386_vm2 = vcmp.ge.f32.partialorder %v384_v38, 0.0 }
 0x129   : > { %v389_v41 = vand.u32 2147483647, %v383_v39  ;;  %vm385_vm3 = vcmp.ge.f32.partialorder %v383_v39, 0.0  ;;  %v388_v14 = vsel %vm386_vm2, 1.0, %v872_v13 }
 0x12a   : > { %v392_v42 = vmul.f32 0.3275911, %v390_v40  ;;  %v418_v46 = vmul.f32 %v390_v40, %v390_v40  ;;  %v387_v16 = vsel %vm385_vm3, 1.0, %v872_v13 }
 0x12b   : > { %v391_v43 = vmul.f32 0.3275911, %v389_v41  ;;  %v417_v47 = vmul.f32 %v389_v41, %v389_v41 }
 0x12c   : > { %v394_v44 = vadd.f32 1.0, %v392_v42  ;;  %v420_v49 = vsub.f32 0.0, %v418_v46 }
 0x12d   : > { %v393_v45 = vadd.f32 1.0, %v391_v43  ;;  %v419_v51 = vsub.f32 0.0, %v417_v47 }
 0x12e   : > { %800 = vrcp.f32 %v394_v44  ;;  %v423_v55 = vmul.f32 1.442695, %v420_v49 }
 0x12f   : > { %802 = vrcp.f32 %v393_v45  ;;  %v421_v57 = vmul.f32 1.442695, %v419_v51 }
 0x130   : > { %804 = vpow2.f32 %v423_v55 }
 0x131   : > { %806 = vpow2.f32 %v421_v57 }
 0x138   : > { %v801_v48 = vpop.eup %800 }
 0x139   : > { %v803_v50 = vpop.eup %802  ;;  %v400_v52 = vmul.f32 1.0614054, %v801_v48 }
 0x13a   : > { %v399_v53 = vmul.f32 1.0614054, %v803_v50  ;;  %v805_v7 = vpop.eup %804 }
 0x13b   : > { %v402_v54 = vadd.f32 -1.4531521, %v400_v52  ;;  %v807_v9 = vpop.eup %806 }
 0x13c   : > { %v401_v56 = vadd.f32 -1.4531521, %v399_v53 }
 0x13d   : > { %v404_v58 = vmul.f32 %v801_v48, %v402_v54 }
 0x13e   : > { %v403_v59 = vmul.f32 %v803_v50, %v401_v56 }
 0x13f   : > { %v406_v60 = vadd.f32 1.4214138, %v404_v58 }
 0x140   : > { %v405_v61 = vadd.f32 1.4214138, %v403_v59 }
 0x141   : > { %v408_v62 = vmul.f32 %v801_v48, %v406_v60 }
 0x142   : > { %v407_v63 = vmul.f32 %v803_v50, %v405_v61 }
 0x143   : > { %v410_v0 = vadd.f32 -0.28449672, %v408_v62 }
 0x144   : > { %v409_v1 = vadd.f32 -0.28449672, %v407_v63 }
 0x145   : > { %v412_v2 = vmul.f32 %v801_v48, %v410_v0 }
 0x146   : > { %v411_v3 = vmul.f32 %v803_v50, %v409_v1 }
 0x147   : > { %v414_v4 = vadd.f32 0.2548296, %v412_v2 }
 0x148   : > { %v413_v5 = vadd.f32 0.2548296, %v411_v3 }
 0x149   : > { %v416_v6 = vmul.f32 %v801_v48, %v414_v4 }
 0x14a   : > { %v415_v8 = vmul.f32 %v803_v50, %v413_v5 }
 0x14b   : > { %v426_v10 = vmul.f32 %v805_v7, %v416_v6 }
 0x14c   : > { %v425_v11 = vmul.f32 %v807_v9, %v415_v8 }
 0x14d   : > { %v428_v12 = vsub.f32 1.0, %v426_v10 }
 0x14e   : > { %v427_v15 = vsub.f32 1.0, %v425_v11 }
 0x14f   : > { %v430_v17 = vmul.f32 %v428_v12, %v388_v14 }
 0x150   : > { %v429_v18 = vmul.f32 %v427_v15, %v387_v16 }
 0x151   : > { %v432_v19 = vadd.f32 1.0, %v430_v17 }
 0x152   : > { %v431_v21 = vadd.f32 1.0, %v429_v18 }
 0x153   : > { %v434_v24 = vmul.f32 %v432_v19, %v382_v22 }
 0x154   : > { %v433_v23 = vmul.f32 %v431_v21, %v381_v20 }
 0x156   : > { %699 = vmatprep.mubr.f32.mxu1 %v433_v23 }
 0x157   : > { %700 = vmatmul.mubr.f32.vlgmr.msra.gmra.mrb[0].mxu1 %v434_v24 }
 0x22a   : > { %v701_v26 = vpop.f32.mrb[0].mxu1 }
 0x22b   : > { %v518_v27 = vadd.f32 %v701_v26, %v625_v25  ;;  %v512_v28 = vpop.f32.mrb[1].mxu1 }
 0x22c   : > { %v513_v29 = vadd.f32 %v625_v25, %v512_v28 }
 0x22d   : > { %522 = vst.msk [vmem:[%s218_s9 + $0x8] sm:$0xff] %vm251_vm0, %v518_v27 }
 0x22e   : > { %521 = vst.msk [vmem:[%s218_s9] sm:$0xff] %vm251_vm0, %v513_v29 }
 0x22f   : > { %821 = shalt.err (!%p818_p3)
}
 0x230   : > { %s822_s30 = scalar_lea.hbm %s1075_s14, 256  ;;  %s826_s6 = scalar_lea.hbm %s1125_s5, 512 }
 0x231   : > { %p823_p4 = scmp.ne.s32.totalorder %s1075_s14, %s822_s30  ;;  %p827_p9 = scmp.lt.u32.totalorder %s1075_s14, %s1125_s5 }
 0x232   : > { %p828_p10 = scmp.lt.u32.totalorder %s826_s6, %s822_s30  ;;  %p830_p12 = scmp.lt.u32.totalorder %s822_s30, %s1075_s14 }
 0x233   : > { %p824_p7 = pnand %p823_p4, %p944_p5 }
 0x234   : > { %p829_p11 = por %p828_p10, %p827_p9 }
 0x235   : > { %p825_p8 = pneg %p824_p7 }
 0x236   : > { %p831_p13 = por %p830_p12, %p829_p11 }
 0x238   : > { %p832_p0 = pnand %p831_p13, %p825_p8 }
 0x23a   : > { %835 = shalt.err (!%p832_p0)
}
 0x23b   : > { %s874_s9 = smov 128   ;;  %s875_s11 = smov 8  }
 0x23c   : > { %758 = dma.vmem_to_hbm [thread:$0]  (%p944_p5), %s1070_s10, 256, %s1075_s14, %s1079_s15, %s874_s9, %s874_s9, %s875_s11  }
 0x23d PF: > { %p764_p1 = scmp.ge.s32.totalorder %s870_s21, 2  ;;  %s552_s12 = sand.u32 1, %s858_s18  }
 0x23e   : > { %s553_s13 = scalar_lea.sflag [#allocation3], %s552_s12 }
 0x23f   : > { %p761_p2 = pnand %p764_p1, %p948_p6 }
 0x241   : > { %853 = dma.done.wait (!%p761_p2), %s553_s13, 256  }
 0x242   : > { %855 = vsyncadd (!%p761_p2), %s553_s13, 4294967040  ;;  %p15_p3 = scmp.ge.s32.totalorder %s931_s24, 4   ;;  %s1130_s18 = smov %s862_s19 }
 0x243   : > { %s1131_s19 = smov %s866_s20  ;;  %s1132_s20 = smov %s942_s27 }
 0x244   : > { %s1133_s21 = smov %s931_s24  ;;  %17 = sbr.rel (!%p15_p3) target bundleno = 3 (0x3), region = 75 }
 0x24b   :  { %558 = vsyncpa [#allocation3], 1 }
 0x24c   :  { %560 = vsyncpa [#allocation3 + $0x1], 1 }

</bundles_post_ra>
